<compile_context>
chip_gen: v7x
topology: tpu7x:2x2x1
jax: 0.10.0
libtpu: 0.0.40
codegen_flags: <defaults>
</compile_context>

<pallas_src>
import numpy as np
import jax
import jax.numpy as jnp
from jax.experimental import pallas as pl
from jax.experimental.pallas import tpu as pltpu


def _round_up(x, m):
    return ((x + m - 1) // m) * m


# ----------------------------------------------------------------------------
# Pallas kernel: whole forward pass (3 matmuls + tanh + tanh + softmax)
# Weights arrive in bf16, biases in f32.  Accumulation is always f32.
# ----------------------------------------------------------------------------
def _policy_kernel(x_ref, w1_ref, b1_ref, w2_ref, b2_ref, w3_ref, b3_ref, out_ref):
    x = x_ref[...]                       # (TB, obs_dim) bf16
    b1 = b1_ref[...]                     # (1, 64) f32
    b2 = b2_ref[...]                     # (1, 64) f32
    b3 = b3_ref[...]                     # (1, n_act) f32

    # layer 1: Linear + tanh  (MXU matmul bf16 -> f32 acc, VPU/EUP tanh in f32)
    h1 = jnp.tanh(
        jnp.dot(x, w1_ref[...], preferred_element_type=jnp.float32) + b1
    )

    # layer 2: Linear + tanh
    h2 = jnp.tanh(
        jnp.dot(h1.astype(jnp.bfloat16), w2_ref[...],
                preferred_element_type=jnp.float32) + b2
    )

    # layer 3: Linear (logits)
    logits = (
        jnp.dot(h2.astype(jnp.bfloat16), w3_ref[...],
                preferred_element_type=jnp.float32) + b3
    )

    # softmax over dim=1 (last dim), numerically stable; reciprocal-multiply
    m = jnp.max(logits, axis=-1, keepdims=True)
    e = jnp.exp(logits - m)
    inv = pl.reciprocal(jnp.sum(e, axis=-1, keepdims=True), approx=False)
    out_ref[...] = e * inv


def discrete_policy_forward(x, params, block_b=512):
    """x: (batch, obs_dim) f32. params: dict with w1,b1,w2,b2,w3,b3 (f32)."""
    batch, obs_dim = x.shape
    n_act = params["w3"].shape[1]

    # Choose the batch tile: at most `block_b` rows, at least the (sublane-
    # aligned) batch itself for tiny batches.  Pad batch to a multiple of it.
    block_b = min(block_b, _round_up(batch, 8))
    padded = _round_up(batch, block_b)
    if padded != batch:
        x = jnp.pad(x, ((0, padded - batch), (0, 0)))

    # bf16 matmul operands; biases stay f32.
    x_bf = x.astype(jnp.bfloat16)
    w1 = params["w1"].astype(jnp.bfloat16)
    w2 = params["w2"].astype(jnp.bfloat16)
    w3 = params["w3"].astype(jnp.bfloat16)
    b1, b2, b3 = params["b1"], params["b2"], params["b3"]

    grid = (padded // block_b,)

    out = pl.pallas_call(
        _policy_kernel,
        out_shape=jax.ShapeDtypeStruct((padded, n_act), jnp.float32),
        grid=grid,
        in_specs=[
            # x: walk the batch axis
            pl.BlockSpec((block_b, obs_dim), lambda i: (i, 0)),
            # weights / biases: constant block index -> stay resident in VMEM
            pl.BlockSpec(w1.shape, lambda i: (0, 0)),
            pl.BlockSpec(b1.shape, lambda i: (0, 0)),
            pl.BlockSpec(w2.shape, lambda i: (0, 0)),
            pl.BlockSpec(b2.shape, lambda i: (0, 0)),
            pl.BlockSpec(w3.shape, lambda i: (0, 0)),
            pl.BlockSpec(b3.shape, lambda i: (0, 0)),
        ],
        out_specs=pl.BlockSpec((block_b, n_act), lambda i: (i, 0)),
        compiler_params=pltpu.CompilerParams(
            dimension_semantics=("parallel",)),  # megacore split on v7x
    )(x_bf, w1, b1, w2, b2, w3, b3)

    return out[:batch]


# ----------------------------------------------------------------------------
# Deterministic parameter initialization (orthogonal weights, zero biases),
# mirroring `layer_init` in the PyTorch module.
# ----------------------------------------------------------------------------
def _orthogonal(key, in_dim, out_dim, std):
    # QR-based orthogonal init on the (out, in) matrix (PyTorch convention),
    # then transpose to (in, out) for the kernel's x @ W layout.
    a = jax.random.normal(key, (max(out_dim, in_dim), min(out_dim, in_dim)),
                          dtype=jnp.float32)
    q, r = jnp.linalg.qr(a)
    q = q * jnp.sign(jnp.diagonal(r))  # make deterministic up to sign
    if out_dim < in_dim:
        w = q.T[:out_dim, :in_dim]
    else:
        w = q[:out_dim, :in_dim]
    return (std * w).T  # (in_dim, out_dim)


def init_params(key, obs_dim, n_actions, hidden=64):
    k1, k2, k3 = jax.random.split(key, 3)
    std = float(np.sqrt(2.0))
    return {
        "w1": _orthogonal(k1, obs_dim, hidden, std),
        "b1": jnp.zeros((1, hidden), jnp.float32),
        "w2": _orthogonal(k2, hidden, hidden, std),
        "b2": jnp.zeros((1, hidden), jnp.float32),
        "w3": _orthogonal(k3, hidden, n_actions, 0.01),
        "b3": jnp.zeros((1, n_actions), jnp.float32),
    }


# ----------------------------------------------------------------------------
# Plain-JAX references
# ----------------------------------------------------------------------------
def _reference_f32(x, p):
    h1 = jnp.tanh(x @ p["w1"] + p["b1"])
    h2 = jnp.tanh(h1 @ p["w2"] + p["b2"])
    logits = h2 @ p["w3"] + p["b3"]
    return jax.nn.softmax(logits, axis=1)


def _reference_bf16(x, p):
    # Mirrors the kernel's bf16-operand / f32-accumulate matmuls.
    bf = jnp.bfloat16
    f32 = jnp.float32
    h1 = jnp.tanh(jnp.dot(x.astype(bf), p["w1"].astype(bf),
                          preferred_element_type=f32) + p["b1"])
    h2 = jnp.tanh(jnp.dot(h1.astype(bf), p["w2"].astype(bf),
                          preferred_element_type=f32) + p["b2"])
    logits = jnp.dot(h2.astype(bf), p["w3"].astype(bf),
                     preferred_element_type=f32) + p["b3"]
    return jax.nn.softmax(logits, axis=1)


if __name__ == "__main__":
    key = jax.random.PRNGKey(0)
    kx, kx2, kp = jax.random.split(key, 3)

    batch, obs_dim, n_actions = 8, 8, 6  # small shapes consistent with the module
    x = jax.random.normal(kx, (batch, obs_dim), dtype=jnp.float32)
    params = init_params(kp, obs_dim, n_actions)

    # --- single-block path (batch fits in one tile) ---
    out = jax.block_until_ready(discrete_policy_forward(x, params))
    ref_bf = _reference_bf16(x, params)
    ref_f32 = _reference_f32(x, params)
    np.testing.assert_allclose(np.asarray(out), np.asarray(ref_bf),
                               rtol=1e-3, atol=1e-3)
    np.testing.assert_allclose(np.asarray(out), np.asarray(ref_f32),
                               rtol=0, atol=1e-2)
    np.testing.assert_allclose(np.asarray(out).sum(axis=1), np.ones(batch),
                               rtol=1e-5, atol=1e-5)

    # --- multi-step grid path with ragged batch (exercises padding + grid) ---
    batch2 = 100
    x2 = jax.random.normal(kx2, (batch2, obs_dim), dtype=jnp.float32)
    out2 = jax.block_until_ready(discrete_policy_forward(x2, params, block_b=32))
    ref2 = _reference_bf16(x2, params)
    assert out2.shape == (batch2, n_actions)
    np.testing.assert_allclose(np.asarray(out2), np.asarray(ref2),
                               rtol=1e-3, atol=1e-3)
    np.testing.assert_allclose(np.asarray(out2).sum(axis=1), np.ones(batch2),
                               rtol=1e-5, atol=1e-5)

    print("KERNEL_OK")
</pallas_src>

<mosaic_0001>
module attributes {stable_mosaic.version = 11 : i64} {
  func.func @_policy_kernel(%arg0: i32, %arg1: memref<8x8xbf16, #tpu.memory_space<vmem>>, %arg2: memref<8x64xbf16, #tpu.memory_space<vmem>>, %arg3: memref<1x64xf32, #tpu.memory_space<vmem>>, %arg4: memref<64x64xbf16, #tpu.memory_space<vmem>>, %arg5: memref<1x64xf32, #tpu.memory_space<vmem>>, %arg6: memref<64x6xbf16, #tpu.memory_space<vmem>>, %arg7: memref<1x6xf32, #tpu.memory_space<vmem>>, %arg8: memref<8x6xf32, #tpu.memory_space<vmem>>) attributes {dimension_semantics = [#tpu.dimension_semantics<parallel>], iteration_bounds = array<i64: 1>, scalar_prefetch = 0 : i64, scratch_operands = 0 : i64, tpu.core_type = #tpu.core_type<tc>, window_params = [{transform_indices = @transform_0, window_bounds = array<i64: 8, 8>}, {pipeline_mode = #tpu.pipeline_mode<synchronous>, transform_indices = @transform_1, window_bounds = array<i64: 8, 64>}, {pipeline_mode = #tpu.pipeline_mode<synchronous>, transform_indices = @transform_2, window_bounds = array<i64: 1, 64>}, {pipeline_mode = #tpu.pipeline_mode<synchronous>, transform_indices = @transform_3, window_bounds = array<i64: 64, 64>}, {pipeline_mode = #tpu.pipeline_mode<synchronous>, transform_indices = @transform_4, window_bounds = array<i64: 1, 64>}, {pipeline_mode = #tpu.pipeline_mode<synchronous>, transform_indices = @transform_5, window_bounds = array<i64: 64, 6>}, {pipeline_mode = #tpu.pipeline_mode<synchronous>, transform_indices = @transform_6, window_bounds = array<i64: 1, 6>}, {transform_indices = @transform_7, window_bounds = array<i64: 8, 6>}]} {
    %c0 = arith.constant 0 : index
    %c0_0 = arith.constant 0 : index
    %0 = vector.load %arg1[%c0, %c0_0] : memref<8x8xbf16, #tpu.memory_space<vmem>>, vector<8x8xbf16>
    %c0_1 = arith.constant 0 : index
    %c0_2 = arith.constant 0 : index
    %1 = vector.load %arg3[%c0_1, %c0_2] : memref<1x64xf32, #tpu.memory_space<vmem>>, vector<1x64xf32>
    %c0_3 = arith.constant 0 : index
    %c0_4 = arith.constant 0 : index
    %2 = vector.load %arg5[%c0_3, %c0_4] : memref<1x64xf32, #tpu.memory_space<vmem>>, vector<1x64xf32>
    %c0_5 = arith.constant 0 : index
    %c0_6 = arith.constant 0 : index
    %3 = vector.load %arg7[%c0_5, %c0_6] : memref<1x6xf32, #tpu.memory_space<vmem>>, vector<1x6xf32>
    %c0_7 = arith.constant 0 : index
    %c0_8 = arith.constant 0 : index
    %4 = vector.load %arg2[%c0_7, %c0_8] : memref<8x64xbf16, #tpu.memory_space<vmem>>, vector<8x64xbf16>
    %cst = arith.constant dense<0.000000e+00> : vector<8x64xf32>
    %5 = tpu.matmul %0, %4, %cst {dimension_numbers = #tpu.dot_dimension_numbers<[1], [0], [0], [1], [0, 0, 1, 1], [], []>} : vector<8x8xbf16>, vector<8x64xbf16>, vector<8x64xf32> -> vector<8x64xf32>
    %6 = vector.broadcast %1 : vector<1x64xf32> to vector<8x64xf32>
    %7 = arith.addf %5, %6 : vector<8x64xf32>
    %8 = math.tanh %7 : vector<8x64xf32>
    %9 = arith.truncf %8 : vector<8x64xf32> to vector<8x64xbf16>
    %c0_9 = arith.constant 0 : index
    %c0_10 = arith.constant 0 : index
    %10 = vector.load %arg4[%c0_9, %c0_10] : memref<64x64xbf16, #tpu.memory_space<vmem>>, vector<64x64xbf16>
    %cst_11 = arith.constant dense<0.000000e+00> : vector<8x64xf32>
    %11 = tpu.matmul %9, %10, %cst_11 {dimension_numbers = #tpu.dot_dimension_numbers<[1], [0], [0], [1], [0, 0, 1, 1], [], []>} : vector<8x64xbf16>, vector<64x64xbf16>, vector<8x64xf32> -> vector<8x64xf32>
    %12 = vector.broadcast %2 : vector<1x64xf32> to vector<8x64xf32>
    %13 = arith.addf %11, %12 : vector<8x64xf32>
    %14 = math.tanh %13 : vector<8x64xf32>
    %15 = arith.truncf %14 : vector<8x64xf32> to vector<8x64xbf16>
    %c0_12 = arith.constant 0 : index
    %c0_13 = arith.constant 0 : index
    %16 = vector.load %arg6[%c0_12, %c0_13] : memref<64x6xbf16, #tpu.memory_space<vmem>>, vector<64x6xbf16>
    %cst_14 = arith.constant dense<0.000000e+00> : vector<8x6xf32>
    %17 = tpu.matmul %15, %16, %cst_14 {dimension_numbers = #tpu.dot_dimension_numbers<[1], [0], [0], [1], [0, 0, 1, 1], [], []>} : vector<8x64xbf16>, vector<64x6xbf16>, vector<8x6xf32> -> vector<8x6xf32>
    %18 = vector.broadcast %3 : vector<1x6xf32> to vector<8x6xf32>
    %19 = arith.addf %17, %18 : vector<8x6xf32>
    %cst_15 = arith.constant dense<0xFF800000> : vector<8xf32>
    %20 = vector.multi_reduction <maximumf>, %19, %cst_15 [1] : vector<8x6xf32> to vector<8xf32>
    %21 = vector.shape_cast %20 : vector<8xf32> to vector<8x1xf32>
    %22 = vector.broadcast %21 : vector<8x1xf32> to vector<8x6xf32>
    %23 = arith.subf %19, %22 : vector<8x6xf32>
    %24 = math.exp %23 : vector<8x6xf32>
    %cst_16 = arith.constant dense<0.000000e+00> : vector<8xf32>
    %25 = vector.multi_reduction <add>, %24, %cst_16 [1] : vector<8x6xf32> to vector<8xf32>
    %26 = vector.shape_cast %25 : vector<8xf32> to vector<8x1xf32>
    %27 = tpu.reciprocal %26 : vector<8x1xf32> -> vector<8x1xf32>
    %28 = vector.broadcast %27 : vector<8x1xf32> to vector<8x6xf32>
    %29 = arith.mulf %24, %28 : vector<8x6xf32>
    %c0_17 = arith.constant 0 : index
    %c0_18 = arith.constant 0 : index
    %30 = vector.load %arg8[%c0_17, %c0_18] : memref<8x6xf32, #tpu.memory_space<vmem>>, vector<8x6xf32>
    tpu.vector_store %arg8[%c0_17, %c0_18], %29 {strides = array<i32>} : memref<8x6xf32, #tpu.memory_space<vmem>>, vector<8x6xf32>,
    return
  }
  func.func @transform_0(%arg0: i32) -> (i32, i32) {
    %c0_i32 = arith.constant 0 : i32
    %c0_i32_0 = arith.constant 0 : i32
    return %arg0, %c0_i32 : i32, i32
  }
  func.func @transform_1(%arg0: i32) -> (i32, i32) {
    %c0_i32 = arith.constant 0 : i32
    %c0_i32_0 = arith.constant 0 : i32
    %c0_i32_1 = arith.constant 0 : i32
    return %c0_i32, %c0_i32_0 : i32, i32
  }
  func.func @transform_2(%arg0: i32) -> (i32, i32) {
    %c0_i32 = arith.constant 0 : i32
    %c0_i32_0 = arith.constant 0 : i32
    %c0_i32_1 = arith.constant 0 : i32
    return %c0_i32, %c0_i32_0 : i32, i32
  }
  func.func @transform_3(%arg0: i32) -> (i32, i32) {
    %c0_i32 = arith.constant 0 : i32
    %c0_i32_0 = arith.constant 0 : i32
    %c0_i32_1 = arith.constant 0 : i32
    return %c0_i32, %c0_i32_0 : i32, i32
  }
  func.func @transform_4(%arg0: i32) -> (i32, i32) {
    %c0_i32 = arith.constant 0 : i32
    %c0_i32_0 = arith.constant 0 : i32
    %c0_i32_1 = arith.constant 0 : i32
    return %c0_i32, %c0_i32_0 : i32, i32
  }
  func.func @transform_5(%arg0: i32) -> (i32, i32) {
    %c0_i32 = arith.constant 0 : i32
    %c0_i32_0 = arith.constant 0 : i32
    %c0_i32_1 = arith.constant 0 : i32
    return %c0_i32, %c0_i32_0 : i32, i32
  }
  func.func @transform_6(%arg0: i32) -> (i32, i32) {
    %c0_i32 = arith.constant 0 : i32
    %c0_i32_0 = arith.constant 0 : i32
    %c0_i32_1 = arith.constant 0 : i32
    return %c0_i32, %c0_i32_0 : i32, i32
  }
  func.func @transform_7(%arg0: i32) -> (i32, i32) {
    %c0_i32 = arith.constant 0 : i32
    %c0_i32_0 = arith.constant 0 : i32
    return %arg0, %c0_i32 : i32, i32
  }
}

</mosaic_0001>

<bundles_post_ra>
// kernel: tpu_custom_call.1
= control target key start
LH: loop header
LB: loop body
LE: loop exit
PB: predicated region body
PF: predicated region fallthrough
CT: control target
= control target key end

     0   :  { %vm43_vm0 = vcmask 1043456   ;;  %v380_v1 = vmov 0.0   ;;  %vm381_vm1 = vmmov 0   ;;  %vm39_vm2 = vcmask 64512   ;;  %s479_s0 = inlined_call_operand.vmem [shape: bf16[8,8], index: 0, kind: input, shape index: {}]   ;;  %s480_s1 = inlined_call_operand.vmem [shape: bf16[8,64], index: 1, kind: input, shape index: {}]   ;;  %s481_s2 = inlined_call_operand.vmem [shape: f32[1,64], index: 2, kind: input, shape index: {}]   ;;  %s482_s3 = inlined_call_operand.vmem [shape: bf16[64,64], index: 3, kind: input, shape index: {}]   ;;  %s483_s4 = inlined_call_operand.vmem [shape: f32[1,64], index: 4, kind: input, shape index: {}]   ;;  %s484_s5 = inlined_call_operand.vmem [shape: bf16[64,6], index: 5, kind: input, shape index: {}]   ;;  %s485_s6 = inlined_call_operand.vmem [shape: f32[1,6], index: 6, kind: input, shape index: {}]   ;;  %s486_s7 = inlined_call_operand.hbm [shape: f32[8,6], index: 7, kind: output, shape index: {}]  }
   0x1   :  { %v32_v0 = vld [vmem:[%s480_s1] sm:$0xf]  ;;  %307 = vmatprep.subr.bf16.mxu0 %v380_v1  ;;  %309 = vmatprep.mubr.msk.bf16.mxu0 %vm381_vm1, %v380_v1 }
   0x2   :  { %v45_v2 = vsel %vm43_vm0, %v32_v0, 0  ;;  %v28_v3 = vld [vmem:[%s479_s0] sm:$0xf]  ;;  %313 = vmatprep.subr.bf16.mxu1 %v380_v1  ;;  %321 = vmatprep.mubr.msk.bf16.mxu1 %vm381_vm1, %v380_v1 }
   0x3   :  { %308 = vmatpush3.bf16.msra.mxu0 %v45_v2 }
   0x4   :  { %325 = vmatprep.subr.bf16.mxu0 %v380_v1 }
   0x6   :  { %310 = vmatmul.mubr.msk.bf16.vlgmr.msra.gmra.mrb[0].mxu0 %vm39_vm2, %v28_v3 }
   0x7   :  { %333 = vmatprep.mubr.msk.bf16.mxu0 %vm381_vm1, %v380_v1 }
   0x8   :  { %12 = vsyncpa [#allocation3], 0  ;;  %v340_v4 = vld [vmem:[%s482_s3] sm:$0xff]   ;;  %v341_v5 = vld [vmem:[%s482_s3 + $0x8] sm:$0xff]   ;;  %vm127_vm3 = vcmask 523264   ;;  %vm254_vm4 = vcmask 48128  }
   0x9   :  { %314 = vmatpush3.bf16.msra.mxu1 %v340_v4  ;;  %v342_v6 = vld [vmem:[%s482_s3 + $0x10] sm:$0xff]   ;;  %v343_v7 = vld [vmem:[%s482_s3 + $0x18] sm:$0xff]   ;;  %v281_v8 = vld [vmem:[%s481_s2] ss:$0 sm:$0xff] }
   0xa   :  { %315 = vmatprep.subr.bf16.mxu1 %v380_v1  ;;  %v344_v16 = vld [vmem:[%s484_s5] sm:$0xff]   ;;  %v345_v17 = vld [vmem:[%s484_s5 + $0x8] sm:$0xff]   ;;  %v346_v18 = vld [vmem:[%s484_s5 + $0x10] sm:$0xff]  }
   0xb   :  { %326 = vmatpush3.bf16.msra.mxu0 %v344_v16  ;;  %v347_v19 = vld [vmem:[%s484_s5 + $0x18] sm:$0xff]   ;;  %v283_v20 = vld [vmem:[%s483_s4] ss:$0 sm:$0xff]  ;;  %s382_s4 = smov [#allocation2]  }
   0xc   :  { %327 = vmatprep.subr.bf16.mxu0 %v380_v1  ;;  %v289_v28 = vld [vmem:[%s485_s6] ss:$0 sm:$0xff]  ;;  %s273_s5 = sshll.u32 %s382_s4, 4  ;;  %s274_s5 = int_to_ptr.vmem [resolvable:$true] %s273_s5 }
   0xd   :  { %316 = vmatpush3.bf16.msra.mxu1 %v341_v5  ;;  %s356_s6 = scalar_lea.vmem %s274_s5, 128  ;;  %p361_p1 = scmp.lt.s32.totalorder %s274_s5, %s274_s5 }
   0xe   :  { %317 = vmatprep.subr.bf16.mxu1 %v380_v1  ;;  %p357_p0 = scmp.ne.s32.totalorder %s274_s5, %s356_s6  ;;  %p362_p2 = scmp.lt.s32.totalorder %s356_s6, %s356_s6 }
   0xf   :  { %328 = vmatpush3.bf16.msra.mxu0 %v345_v17 }
  0x10   :  { %329 = vmatprep.subr.bf16.mxu0 %v380_v1  ;;  %p363_p3 = por %p362_p2, %p361_p1 }
  0x11   :  { %318 = vmatpush3.bf16.msra.mxu1 %v342_v6 }
  0x12   :  { %319 = vmatprep.subr.bf16.mxu1 %v380_v1  ;;  %p364_p4 = pnand %p363_p3, %p357_p0 }
  0x13   :  { %330 = vmatpush3.bf16.msra.mxu0 %v346_v18 }
  0x14   :  { %331 = vmatprep.subr.bf16.mxu0 %v380_v1 }
  0x15   :  { %320 = vmatpush3.bf16.msra.mxu1 %v343_v7 }
  0x17   :  { %332 = vmatpush3.bf16.msra.mxu0 %v347_v19 }
  0xd9   :  { %v81_v9 = vpop.f32.mrb[0].mxu0 }
  0xda   :  { %v82_v10 = vadd.f32 %v281_v8, %v81_v9  ;;  %v311_v11 = vpop.f32.mrb[1].mxu0 }
  0xdb   :  { %v84_v12 = vpop.f32.mrb[2].mxu0 }
  0xdc   :  { %348 = vtanh.f32 %v82_v10  ;;  %v312_v13 = vpop.f32.mrb[3].mxu0 }
  0xe6   :  { %v349_v14 = vpop.eup %348 }
  0xe7   :  { %v88_v15 = vpack.c.bf16 %v349_v14, %v349_v14 }
  0xe9   :  { %322 = vmatmul.mubr.msk.bf16.vlgmr.msra.gmra.mrb[0].mxu1 %vm127_vm3, %v88_v15 }
 0x1bc   :  { %v165_v21 = vpop.f32.mrb[0].mxu1 }
 0x1bd   :  { %v166_v22 = vadd.f32 %v283_v20, %v165_v21  ;;  %v323_v23 = vpop.f32.mrb[1].mxu1 }
 0x1be   :  { %v168_v24 = vpop.f32.mrb[2].mxu1 }
 0x1bf   :  { %350 = vtanh.f32 %v166_v22  ;;  %v324_v25 = vpop.f32.mrb[3].mxu1 }
 0x1c9   :  { %v351_v26 = vpop.eup %350 }
 0x1ca   :  { %v172_v27 = vpack.c.bf16 %v351_v26, %v351_v26 }
 0x1cc   :  { %334 = vmatmul.mubr.msk.bf16.vlgmr.msra.gmra.mrb[4].mxu0 %vm127_vm3, %v172_v27 }
 0x29f   :  { %v248_v29 = vpop.f32.mrb[4].mxu0 }
 0x2a0   :  { %v249_v30 = vadd.f32 %v289_v28, %v248_v29  ;;  %v335_v31 = vpop.f32.mrb[5].mxu0 }
 0x2a1   :  { %v251_v32 = vpop.f32.mrb[6].mxu0 }
 0x2a2   :  { %v336_v33 = vpop.f32.mrb[7].mxu0  ;;  %v255_v34 = vsel %vm254_vm4, %v249_v30, -inf }
 0x2a3   :  { %256 = vmax.xlane.f32.xlu0 %v255_v34 }
 0x330   :  { %v257_v35 = vpop.xlane.xlu0 %256 }
 0x331   :  { %v258_v36 = vsub.f32 %v249_v30, %v257_v35 }
 0x333   :  { %v259_v37 = vmul.f32 1.442695, %v258_v36 }
 0x335   :  { %352 = vpow2.f32 %v259_v37 }
 0x33f   :  { %v353_v38 = vpop.eup %352 }
 0x340   :  { %v261_v39 = vsel %vm254_vm4, %v353_v38, 0.0 }
 0x341   :  { %262 = vadd.xlane.f32.xlu0 %v261_v39 }
 0x3ce   :  { %v263_v40 = vpop.xlane.xlu0 %262 }
 0x3cf   :  { %354 = vrcp.f32 %v263_v40 }
 0x3d9   :  { %v355_v41 = vpop.eup %354 }
 0x3da   :  { %v265_v42 = vmul.f32 %v355_v41, %v353_v38 }
 0x3dc   :  { %266 = vst.msk [vmem:[#allocation2] sm:$0xff] %vm254_vm4, %v265_v42 }
 0x3dd   :  { %367 = shalt.err (!%p364_p4)
}
 0x3de   :  { %s368_s25 = scalar_lea.hbm %s486_s7, 128 }
 0x3df   :  { %p369_p5 = scmp.ne.s32.totalorder %s486_s7, %s368_s25  ;;  %p372_p6 = scmp.lt.u32.totalorder %s368_s25, %s486_s7 }
 0x3e1   :  { %p374_p7 = pnand %p372_p6, %p369_p5 }
 0x3e3   :  { %377 = shalt.err (!%p374_p7)
}
 0x3e4   :  { %276 = dma.vmem_to_hbm [thread:$0]  %s274_s5, 128, %s486_s7, [#allocation3]  }
 0x3e5   :  { %378 = dma.done.wait [#allocation3], 128  }
 0x3e6   :  { %379 = vsyncadd [#allocation3], 4294967168 }
 0x3e7   :  { %280 = vsyncpa [#allocation3], 1 }

</bundles_post_ra>
